<compile_context>
chip_gen: v5e
topology: v5e:2x2
jax: 0.10.0
libtpu: 0.0.40
codegen_flags: <defaults>
</compile_context>

<pallas_src>
import jax
import jax.numpy as jnp
from jax.experimental import pallas as pl
from jax.experimental.pallas import tpu as pltpu


def _round_up(x: int, m: int) -> int:
    return ((x + m - 1) // m) * m


def _pick_tile(padded_dim: int, target: int, align: int) -> int:
    """Largest multiple of `align` that is <= target and divides padded_dim."""
    target = max(align, min(target, padded_dim))
    best = align
    t = align
    while t <= target:
        if padded_dim % t == 0:
            best = t
        t += align
    return best


def linear_kernel(x_ref, wt_ref, b_ref, o_ref):
    # x_ref:  (tm, tk) VMEM  -- activation tile
    # wt_ref: (tk, tn) VMEM  -- weight tile, already (D_in, D_out) layout
    # b_ref:  (1,  tn) VMEM  -- bias row (block index constant in k -> resident)
    # o_ref:  (tm, tn) VMEM  -- f32 output tile, VMEM-resident across K
    k = pl.program_id(2)

    @pl.when(k == 0)
    def _():
        # Fold the bias into the accumulator init (no epilogue add needed).
        o_ref[...] = jnp.broadcast_to(b_ref[...], o_ref.shape).astype(o_ref.dtype)

    # Canonical (tm,tk) x (tk,tn) MXU matmul, accumulated directly in o_ref.
    o_ref[...] += jnp.dot(x_ref[...], wt_ref[...],
                          preferred_element_type=jnp.float32)


class PallasLinear:
    """Equivalent of nn.Linear(input_dim, output_dim).forward(x) on TPU."""

    def __init__(self, weight, bias, *,
                 tm_target=512, tn_target=512, tk_target=512,
                 min_flops_for_pallas=1 << 22):
        # weight: (D_out, D_in) float32 (PyTorch layout), bias: (D_out,)
        D_out, D_in = weight.shape
        assert bias.shape == (D_out,)
        self.d_in, self.d_out = D_in, D_out
        self.weight = weight
        self.bias = bias
        self.tm_target = tm_target
        self.min_flops = min_flops_for_pallas

        # Lane-align the stationary dims once.
        self.Kp = _round_up(D_in, 128)
        self.Np = _round_up(D_out, 128)
        self.tk = _pick_tile(self.Kp, tk_target, 128)
        self.tn = _pick_tile(self.Np, tn_target, 128)

        # One-time transpose + pad of the stationary parameters (not in the
        # per-call hot path): weight becomes (Kp, Np) so the kernel RHS has
        # K on sublanes / N on lanes with no per-tile transpose.
        wt = weight.astype(jnp.float32).T
        if (self.Kp, self.Np) != (D_in, D_out):
            wt = jnp.pad(wt, ((0, self.Kp - D_in), (0, self.Np - D_out)))
        self.wt_p = wt                                   # (Kp, Np)
        b = bias.astype(jnp.float32)
        if self.Np != D_out:
            b = jnp.pad(b, (0, self.Np - D_out))
        self.b2d = b.reshape(1, self.Np)                 # (1, Np)

    def __call__(self, x, *, force_pallas=False):
        B, D_in = x.shape
        assert D_in == self.d_in
        x = x.astype(jnp.float32)

        # Tiny-shape fast path: pallas_call would be pure launch/DMA overhead.
        if not force_pallas and 2 * B * D_in * self.d_out < self.min_flops:
            return x @ self.weight.T + self.bias

        Kp, Np, tk, tn = self.Kp, self.Np, self.tk, self.tn
        # M: only align to the 8-sublane requirement, then pick tm dividing it
        # (avoids rounding B up to a full 512-row tile for ragged batches).
        Mp = _round_up(max(B, 8), 8)
        tm = _pick_tile(Mp, self.tm_target, 8)

        x_p = x
        if (Mp, Kp) != (B, D_in):
            x_p = jnp.pad(x, ((0, Mp - B), (0, Kp - D_in)))

        grid = (Mp // tm, Np // tn, Kp // tk)

        out_p = pl.pallas_call(
            linear_kernel,
            out_shape=jax.ShapeDtypeStruct((Mp, Np), jnp.float32),
            grid_spec=pltpu.PrefetchScalarGridSpec(
                num_scalar_prefetch=0,
                grid=grid,
                in_specs=[
                    pl.BlockSpec((tm, tk), lambda i, j, k: (i, k)),   # x
                    pl.BlockSpec((tk, tn), lambda i, j, k: (k, j)),   # W^T (Kp,Np)
                    pl.BlockSpec((1, tn), lambda i, j, k: (0, j)),    # bias
                ],
                out_specs=pl.BlockSpec((tm, tn), lambda i, j, k: (i, j)),
            ),
            compiler_params=pltpu.CompilerParams(
                dimension_semantics=("parallel", "parallel", "arbitrary"),
                vmem_limit_bytes=32 * 1024 * 1024),
            cost_estimate=pl.CostEstimate(
                flops=2 * Mp * Kp * Np,
                transcendentals=0,
                # Count the actual re-streaming: x re-read per N tile, W per M tile.
                bytes_accessed=4 * (Mp * Kp * (Np // tn)
                                    + Kp * Np * (Mp // tm)
                                    + Mp * Np + Np)),
        )(x_p, self.wt_p, self.b2d)

        if (Mp, Np) != (B, self.d_out):
            out_p = out_p[:B, :self.d_out]
        return out_p


if __name__ == "__main__":
    key = jax.random.PRNGKey(0)
    kx, kw, kb, kx2, kw2, kb2 = jax.random.split(key, 6)

    # --- Small shapes consistent with LinearRegression(input_dim, output_dim) ---
    batch, input_dim, output_dim = 8, 32, 16
    bound = 1.0 / (input_dim ** 0.5)
    x = jax.random.normal(kx, (batch, input_dim), dtype=jnp.float32)
    weight = jax.random.uniform(kw, (output_dim, input_dim),
                                minval=-bound, maxval=bound, dtype=jnp.float32)
    bias = jax.random.uniform(kb, (output_dim,),
                              minval=-bound, maxval=bound, dtype=jnp.float32)

    lin = PallasLinear(weight, bias)
    ref = x @ weight.T + bias

    # Force the Pallas kernel so it actually runs on TPU even at tiny shapes.
    out = lin(x, force_pallas=True)
    jax.block_until_ready(out)
    assert out.shape == (batch, output_dim)
    assert jnp.allclose(out, ref, atol=1e-5, rtol=1e-5)

    # Default path for this tiny problem is the jnp fallback (launch overhead).
    out_fast = lin(x)
    jax.block_until_ready(out_fast)
    assert jnp.allclose(out_fast, ref, atol=1e-5, rtol=1e-5)

    # --- Multi-tile check: exercises K-reduction over several grid steps,
    #     padding of D_out, and tile selection that divides padded dims. ---
    B2, D_in2, D_out2 = 1024, 640, 384
    bound2 = 1.0 / (D_in2 ** 0.5)
    x2 = jax.random.normal(kx2, (B2, D_in2), dtype=jnp.float32)
    w2 = jax.random.uniform(kw2, (D_out2, D_in2),
                            minval=-bound2, maxval=bound2, dtype=jnp.float32)
    b2 = jax.random.uniform(kb2, (D_out2,),
                            minval=-bound2, maxval=bound2, dtype=jnp.float32)
    lin2 = PallasLinear(w2, b2)
    out2 = lin2(x2)
    jax.block_until_ready(out2)
    ref2 = x2 @ w2.T + b2
    assert out2.shape == (B2, D_out2)
    assert jnp.allclose(out2, ref2, atol=2e-4, rtol=2e-4)

    print("KERNEL_OK")
</pallas_src>

<mosaic_0001>
module attributes {stable_mosaic.version = 11 : i64} {
  func.func @linear_kernel(%arg0: i32, %arg1: i32, %arg2: i32, %arg3: memref<8x128xf32, #tpu.memory_space<vmem>>, %arg4: memref<128x128xf32, #tpu.memory_space<vmem>>, %arg5: memref<1x128xf32, #tpu.memory_space<vmem>>, %arg6: memref<8x128xf32, #tpu.memory_space<vmem>>) attributes {dimension_semantics = [#tpu.dimension_semantics<parallel>, #tpu.dimension_semantics<parallel>, #tpu.dimension_semantics<arbitrary>], iteration_bounds = array<i64: 1, 1, 1>, scalar_prefetch = 0 : i64, scratch_operands = 0 : i64, tpu.core_type = #tpu.core_type<tc>, window_params = [{transform_indices = @transform_0, window_bounds = array<i64: 8, 128>}, {transform_indices = @transform_1, window_bounds = array<i64: 128, 128>}, {transform_indices = @transform_2, window_bounds = array<i64: 1, 128>}, {transform_indices = @transform_3, window_bounds = array<i64: 8, 128>}]} {
    %c0_i32 = arith.constant 0 : i32
    %0 = arith.cmpi eq, %arg2, %c0_i32 : i32
    %1 = arith.extui %0 : i1 to i32
    %c0_i32_0 = arith.constant 0 : i32
    %2 = arith.cmpi ne, %1, %c0_i32_0 : i32
    scf.if %2 {
      %c0_8 = arith.constant 0 : index
      %c0_9 = arith.constant 0 : index
      %9 = vector.load %arg5[%c0_8, %c0_9] : memref<1x128xf32, #tpu.memory_space<vmem>>, vector<1x128xf32>
      %10 = vector.shape_cast %9 : vector<1x128xf32> to vector<1x128xf32>
      %11 = vector.broadcast %10 : vector<1x128xf32> to vector<8x128xf32>
      %c0_10 = arith.constant 0 : index
      %c0_11 = arith.constant 0 : index
      %12 = vector.load %arg6[%c0_10, %c0_11] : memref<8x128xf32, #tpu.memory_space<vmem>>, vector<8x128xf32>
      tpu.vector_store %arg6[%c0_10, %c0_11], %11 {strides = array<i32>} : memref<8x128xf32, #tpu.memory_space<vmem>>, vector<8x128xf32>,
    } else {
    }
    %c0 = arith.constant 0 : index
    %c0_1 = arith.constant 0 : index
    %3 = vector.load %arg6[%c0, %c0_1] : memref<8x128xf32, #tpu.memory_space<vmem>>, vector<8x128xf32>
    %c0_2 = arith.constant 0 : index
    %c0_3 = arith.constant 0 : index
    %4 = vector.load %arg3[%c0_2, %c0_3] : memref<8x128xf32, #tpu.memory_space<vmem>>, vector<8x128xf32>
    %c0_4 = arith.constant 0 : index
    %c0_5 = arith.constant 0 : index
    %5 = vector.load %arg4[%c0_4, %c0_5] : memref<128x128xf32, #tpu.memory_space<vmem>>, vector<128x128xf32>
    %cst = arith.constant dense<0.000000e+00> : vector<8x128xf32>
    %6 = tpu.matmul %4, %5, %cst {dimension_numbers = #tpu.dot_dimension_numbers<[1], [0], [0], [1], [0, 0, 1, 1], [], []>} : vector<8x128xf32>, vector<128x128xf32>, vector<8x128xf32> -> vector<8x128xf32>
    %7 = arith.addf %3, %6 : vector<8x128xf32>
    %c0_6 = arith.constant 0 : index
    %c0_7 = arith.constant 0 : index
    %8 = vector.load %arg6[%c0_6, %c0_7] : memref<8x128xf32, #tpu.memory_space<vmem>>, vector<8x128xf32>
    tpu.vector_store %arg6[%c0_6, %c0_7], %7 {strides = array<i32>} : memref<8x128xf32, #tpu.memory_space<vmem>>, vector<8x128xf32>,
    return
  }
  func.func @transform_0(%arg0: i32, %arg1: i32, %arg2: i32) -> (i32, i32) {
    %c0_i32 = arith.constant 0 : i32
    return %arg0, %arg2 : i32, i32
  }
  func.func @transform_1(%arg0: i32, %arg1: i32, %arg2: i32) -> (i32, i32) {
    %c0_i32 = arith.constant 0 : i32
    return %arg2, %arg1 : i32, i32
  }
  func.func @transform_2(%arg0: i32, %arg1: i32, %arg2: i32) -> (i32, i32) {
    %c0_i32 = arith.constant 0 : i32
    %c0_i32_0 = arith.constant 0 : i32
    return %c0_i32, %arg1 : i32, i32
  }
  func.func @transform_3(%arg0: i32, %arg1: i32, %arg2: i32) -> (i32, i32) {
    %c0_i32 = arith.constant 0 : i32
    return %arg0, %arg1 : i32, i32
  }
}

</mosaic_0001>

<bundles_post_ra>
// kernel: tpu_custom_call.1
= control target key start
LH: loop header
LB: loop body
LE: loop exit
PB: predicated region body
PF: predicated region fallthrough
CT: control target
= control target key end

     0   :  { %8 = vsyncpa [#allocation3], 0  ;;  %s233_s0 = inlined_call_operand.hbm [shape: f32[8,128], index: 0, kind: input, shape index: {}]   ;;  %s234_s1 = inlined_call_operand.hbm [shape: f32[128,128], index: 1, kind: input, shape index: {}]   ;;  %s235_s2 = inlined_call_operand.vmem [shape: f32[1,128], index: 2, kind: input, shape index: {}]   ;;  %s236_s3 = inlined_call_operand.hbm [shape: f32[8,128], index: 3, kind: output, shape index: {}]  }
   0x1   :  { %9 = vsyncpa [#allocation6], 0 }
   0x2   :  { %10 = vsyncpa [#allocation4], 0  ;;  %s16_s14 = sshll.u32 %s233_s0, 4  ;;  %s196_s15 = smov [#allocation2]   ;;  %s17_s14 = int_to_ptr.hbm [resolvable:$true] %s16_s14 }
   0x3   :  { %s18_s16 = sshll.u32 %s196_s15, 4  ;;  %s26_s19 = sshll.u32 %s234_s1, 4  ;;  %s19_s16 = int_to_ptr.vmem [resolvable:$true] %s18_s16  ;;  %s27_s19 = int_to_ptr.hbm [resolvable:$true] %s26_s19 }
   0x4   :  { %21 = dma.hbm_to_vmem [thread:$0]  %s17_s14, 128, %s19_s16, [#allocation3]  }
   0x5   :  { %s197_s20 = smov [#allocation5]   ;;  %s198_s22 = smov 128  }
   0x6   :  { %s28_s21 = sshll.u32 %s197_s20, 4  ;;  %s199_s23 = smov 8   ;;  %s29_s21 = int_to_ptr.vmem [resolvable:$true] %s28_s21 }
   0x7   :  { %34 = dma.hbm_to_vmem [thread:$0]  %s27_s19, 2048, %s29_s21, [#allocation6], %s198_s22, %s198_s22, %s199_s23  }
   0x8   :  { %190 = dma.done.wait [#allocation3], 128  }
   0x9   :  { %191 = vsyncadd [#allocation3], 4294967168 }
   0xa   :  { %192 = dma.done.wait [#allocation6], 2048  }
   0xb   :  { %193 = vsyncadd [#allocation6], 4294965248  ;;  %v71_v0 = vld [vmem:[#allocation5 + $0x78] sm:$0xff]  ;;  %v70_v1 = vld [vmem:[#allocation5 + $0x70] sm:$0xff]  ;;  %s200_s24 = smov [#allocation7]   ;;  %s101_s28 = sshll.u32 %s236_s3, 4  ;;  %s102_s28 = int_to_ptr.hbm [resolvable:$true] %s101_s28 }
   0xc   :  { %72 = vmatpush.msra.mxu0 %v71_v0  ;;  %v69_v2 = vld [vmem:[#allocation5 + $0x68] sm:$0xff]  ;;  %v68_v3 = vld [vmem:[#allocation5 + $0x60] sm:$0xff]  ;;  %v67_v4 = vld [vmem:[#allocation5 + $0x58] sm:$0xff]  ;;  %s99_s25 = sshll.u32 %s200_s24, 4  ;;  %s100_s25 = int_to_ptr.vmem [resolvable:$true] %s99_s25 }
   0xd   :  { %v66_v5 = vld [vmem:[#allocation5 + $0x50] sm:$0xff]  ;;  %v65_v6 = vld [vmem:[#allocation5 + $0x48] sm:$0xff]  ;;  %v64_v7 = vld [vmem:[#allocation5 + $0x40] sm:$0xff] }
   0xe   :  { %73 = vmatpush.msra.mxu0 %v70_v1  ;;  %v63_v8 = vld [vmem:[#allocation5 + $0x38] sm:$0xff]  ;;  %v62_v9 = vld [vmem:[#allocation5 + $0x30] sm:$0xff]  ;;  %v61_v10 = vld [vmem:[#allocation5 + $0x28] sm:$0xff] }
   0xf   :  { %v60_v11 = vld [vmem:[#allocation5 + $0x20] sm:$0xff]  ;;  %v59_v12 = vld [vmem:[#allocation5 + $0x18] sm:$0xff]  ;;  %v58_v13 = vld [vmem:[#allocation5 + $0x10] sm:$0xff] }
  0x10   :  { %74 = vmatpush.msra.mxu0 %v69_v2  ;;  %v57_v14 = vld [vmem:[#allocation5 + $0x8] sm:$0xff]  ;;  %v56_v15 = vld [vmem:[#allocation5] sm:$0xff]  ;;  %v55_v16 = vld [vmem:[#allocation2] sm:$0xff] }
  0x11   :  { %v117_v17 = vld [vmem:[%s235_s2] ss:$0 sm:$0xff] }
  0x12   :  { %75 = vmatpush.msra.mxu0 %v68_v3 }
  0x14   :  { %76 = vmatpush.msra.mxu0 %v67_v4 }
  0x16   :  { %77 = vmatpush.msra.mxu0 %v66_v5 }
  0x18   :  { %78 = vmatpush.msra.mxu0 %v65_v6 }
  0x1a   :  { %79 = vmatpush.msra.mxu0 %v64_v7 }
  0x1c   :  { %80 = vmatpush.msra.mxu0 %v63_v8 }
  0x1e   :  { %81 = vmatpush.msra.mxu0 %v62_v9 }
  0x20   :  { %82 = vmatpush.msra.mxu0 %v61_v10 }
  0x22   :  { %83 = vmatpush.msra.mxu0 %v60_v11 }
  0x24   :  { %84 = vmatpush.msra.mxu0 %v59_v12 }
  0x26   :  { %85 = vmatpush.msra.mxu0 %v58_v13 }
  0x28   :  { %86 = vmatpush.msra.mxu0 %v57_v14 }
  0x2a   :  { %87 = vmatpush.msra.mxu0 %v56_v15 }
  0x2b   :  { %88 = vmatmul.f32.vlgmr.msra.gmra.mxu0 %v55_v16 }
  0xa8   :  { %v89_v18 = vpop.f32.mrf.mxu0 }
  0xa9   :  { %v92_v19 = vadd.f32 %v117_v17, %v89_v18 }
  0xab   :  { %93 = vst [vmem:[#allocation7] sm:$0xff] %v92_v19 }
  0xac   :  { %104 = dma.vmem_to_hbm [thread:$0]  %s100_s25, 128, %s102_s28, [#allocation4]  }
  0xad   :  { %194 = dma.done.wait [#allocation4], 128  }
  0xae   :  { %195 = vsyncadd [#allocation4], 4294967168 }
  0xaf   :  { %109 = vsyncpa [#allocation3], 1 }
  0xb0   :  { %110 = vsyncpa [#allocation6], 1 }
  0xb1   :  { %111 = vsyncpa [#allocation4], 1 }

</bundles_post_ra>
